<compile_context>
chip_gen: v5e
topology: v5e:2x2
jax: 0.10.0
libtpu: 0.0.40
codegen_flags: <defaults>
</compile_context>

<pallas_src>
import functools

import jax
import jax.numpy as jnp
from jax.experimental import pallas as pl
from jax.experimental.pallas import tpu as pltpu


def _round_up(x, m):
    return ((x + m - 1) // m) * m


def _predictor_kernel(x_ref, w_ref, b_ref, out_ref):
    # x_ref:   [TN, C]     activations tile (compute dtype, e.g. bf16)
    # w_ref:   [C, Kp]     fused, transposed, padded weights (compute dtype)
    # b_ref:   [1, Kp]     fused, padded bias (f32)
    # out_ref: [TN, Kp]    output tile (output dtype)
    acc = jnp.dot(x_ref[...], w_ref[...], preferred_element_type=jnp.float32)
    out_ref[...] = (acc + b_ref[...]).astype(out_ref.dtype)


def prepare_fused_params(w_cls, b_cls, w_bbox, b_bbox,
                         compute_dtype=jnp.bfloat16):
    """One-time parameter prep (do this at load time, NOT per forward call).

    w_cls:  [K, C]   (PyTorch nn.Linear layout)   b_cls:  [K]
    w_bbox: [4K, C]                               b_bbox: [4K]
    Returns (w_fused [C, Kp], b_fused [1, Kp]) with Kp = round_up(5K, 128).
    """
    K = w_cls.shape[0]
    K4 = w_bbox.shape[0]
    k_tot = K + K4
    k_pad = _round_up(k_tot, 128)

    w_fused = jnp.concatenate([w_cls.T, w_bbox.T], axis=1)          # [C, K+4K]
    w_fused = jnp.pad(w_fused, ((0, 0), (0, k_pad - k_tot)))
    w_fused = w_fused.astype(compute_dtype)

    b_fused = jnp.concatenate([b_cls, b_bbox]).reshape(1, k_tot)     # [1, K+4K]
    b_fused = jnp.pad(b_fused, ((0, 0), (0, k_pad - k_tot)))
    b_fused = b_fused.astype(jnp.float32)                            # bias in f32
    return w_fused, b_fused


@functools.partial(jax.jit, static_argnames=("num_classes",))
def fast_rcnn_predictor_fused(x, w_fused, b_fused, *, num_classes):
    """Forward pass with pre-fused parameters.

    x: [N, C] or [N, C, 1, 1]; returns (scores [N, K], bbox_deltas [N, 4K]).
    """
    if x.ndim == 4:
        assert x.shape[2] == 1 and x.shape[3] == 1
    x2 = x.reshape(x.shape[0], -1)                  # flatten(start_dim=1)

    N, C = x2.shape
    Kp = w_fused.shape[1]
    out_dtype = x2.dtype
    compute_dtype = w_fused.dtype

    xc = x2.astype(compute_dtype)

    # Tile over N. Row multiple of 16 covers both f32 (8) and bf16 (16) packing.
    ROW = 16
    TN = min(256, _round_up(N, ROW))
    N_pad = _round_up(N, TN)
    if N_pad != N:
        xc = jnp.pad(xc, ((0, N_pad - N), (0, 0)))

    out = pl.pallas_call(
        _predictor_kernel,
        out_shape=jax.ShapeDtypeStruct((N_pad, Kp), out_dtype),
        grid=(N_pad // TN,),
        in_specs=[
            pl.BlockSpec((TN, C), lambda i: (i, 0)),    # x tile: marches over N
            pl.BlockSpec((C, Kp), lambda i: (0, 0)),    # weights: resident
            pl.BlockSpec((1, Kp), lambda i: (0, 0)),    # bias: resident
        ],
        out_specs=pl.BlockSpec((TN, Kp), lambda i: (i, 0)),
        compiler_params=pltpu.CompilerParams(
            dimension_semantics=("parallel",),          # megacore on v7x, free elsewhere
        ),
    )(xc, w_fused, b_fused)

    K = num_classes
    scores = out[:N, :K]
    bbox_deltas = out[:N, K:K + 4 * K]
    return scores, bbox_deltas


def fast_rcnn_predictor(x, w_cls, b_cls, w_bbox, b_bbox,
                        compute_dtype=jnp.bfloat16):
    """Convenience wrapper taking raw nn.Linear-layout params.

    Prefer prepare_fused_params() once + fast_rcnn_predictor_fused() in real
    use so the transpose/concat/pad is amortized away from the forward path.
    """
    w_fused, b_fused = prepare_fused_params(
        w_cls, b_cls, w_bbox, b_bbox, compute_dtype=compute_dtype)
    return fast_rcnn_predictor_fused(
        x, w_fused, b_fused, num_classes=w_cls.shape[0])


def init_params(key, in_channels, num_classes, dtype=jnp.float32):
    """Deterministic synthetic init (matches nn.Linear shapes, not values)."""
    k1, k2, k3, k4 = jax.random.split(key, 4)
    bound = 1.0 / (in_channels ** 0.5)
    w_cls = jax.random.uniform(k1, (num_classes, in_channels), dtype,
                               minval=-bound, maxval=bound)
    b_cls = jax.random.uniform(k2, (num_classes,), dtype,
                               minval=-bound, maxval=bound)
    w_bbox = jax.random.uniform(k3, (num_classes * 4, in_channels), dtype,
                                minval=-bound, maxval=bound)
    b_bbox = jax.random.uniform(k4, (num_classes * 4,), dtype,
                                minval=-bound, maxval=bound)
    return w_cls, b_cls, w_bbox, b_bbox


if __name__ == "__main__":
    key = jax.random.PRNGKey(0)
    in_channels = 32
    num_classes = 8
    batch = 2

    kx, kp = jax.random.split(key)
    # ROI-pooled features: [N, C, 1, 1] as in Fast R-CNN heads.
    x = jax.random.normal(kx, (batch, in_channels, 1, 1), dtype=jnp.float32)
    w_cls, b_cls, w_bbox, b_bbox = init_params(kp, in_channels, num_classes)

    # Plain-JAX reference.
    x_flat = x.reshape(batch, -1)
    ref_scores = x_flat @ w_cls.T + b_cls
    ref_bbox = x_flat @ w_bbox.T + b_bbox

    # --- f32 compute path: strict check ---
    wf32, bf32 = prepare_fused_params(w_cls, b_cls, w_bbox, b_bbox,
                                      compute_dtype=jnp.float32)
    scores32, bbox32 = fast_rcnn_predictor_fused(
        x, wf32, bf32, num_classes=num_classes)
    jax.block_until_ready((scores32, bbox32))
    assert scores32.shape == (batch, num_classes)
    assert bbox32.shape == (batch, num_classes * 4)
    assert jnp.allclose(scores32, ref_scores, atol=1e-5)
    assert jnp.allclose(bbox32, ref_bbox, atol=1e-5)

    # --- bf16 compute path (default, perf mode): loose check ---
    wbf, bbf = prepare_fused_params(w_cls, b_cls, w_bbox, b_bbox,
                                    compute_dtype=jnp.bfloat16)
    scores16, bbox16 = fast_rcnn_predictor_fused(
        x, wbf, bbf, num_classes=num_classes)
    jax.block_until_ready((scores16, bbox16))
    assert scores16.shape == (batch, num_classes)
    assert bbox16.shape == (batch, num_classes * 4)
    assert jnp.allclose(scores16, ref_scores, atol=5e-2, rtol=5e-2)
    assert jnp.allclose(bbox16, ref_bbox, atol=5e-2, rtol=5e-2)

    print("KERNEL_OK")
</pallas_src>

<mosaic_0001>
module attributes {stable_mosaic.version = 11 : i64} {
  func.func @_predictor_kernel(%arg0: i32, %arg1: memref<16x32xf32, #tpu.memory_space<vmem>>, %arg2: memref<32x128xf32, #tpu.memory_space<vmem>>, %arg3: memref<1x128xf32, #tpu.memory_space<vmem>>, %arg4: memref<16x128xf32, #tpu.memory_space<vmem>>) attributes {dimension_semantics = [#tpu.dimension_semantics<parallel>], iteration_bounds = array<i64: 1>, scalar_prefetch = 0 : i64, scratch_operands = 0 : i64, tpu.core_type = #tpu.core_type<tc>, window_params = [{transform_indices = @transform_0, window_bounds = array<i64: 16, 32>}, {pipeline_mode = #tpu.pipeline_mode<synchronous>, transform_indices = @transform_1, window_bounds = array<i64: 32, 128>}, {pipeline_mode = #tpu.pipeline_mode<synchronous>, transform_indices = @transform_2, window_bounds = array<i64: 1, 128>}, {transform_indices = @transform_3, window_bounds = array<i64: 16, 128>}]} {
    %c0 = arith.constant 0 : index
    %c0_0 = arith.constant 0 : index
    %0 = vector.load %arg1[%c0, %c0_0] : memref<16x32xf32, #tpu.memory_space<vmem>>, vector<16x32xf32>
    %c0_1 = arith.constant 0 : index
    %c0_2 = arith.constant 0 : index
    %1 = vector.load %arg2[%c0_1, %c0_2] : memref<32x128xf32, #tpu.memory_space<vmem>>, vector<32x128xf32>
    %cst = arith.constant dense<0.000000e+00> : vector<16x128xf32>
    %2 = tpu.matmul %0, %1, %cst {dimension_numbers = #tpu.dot_dimension_numbers<[1], [0], [0], [1], [0, 0, 1, 1], [], []>} : vector<16x32xf32>, vector<32x128xf32>, vector<16x128xf32> -> vector<16x128xf32>
    %c0_3 = arith.constant 0 : index
    %c0_4 = arith.constant 0 : index
    %3 = vector.load %arg3[%c0_3, %c0_4] : memref<1x128xf32, #tpu.memory_space<vmem>>, vector<1x128xf32>
    %4 = vector.broadcast %3 : vector<1x128xf32> to vector<16x128xf32>
    %5 = arith.addf %2, %4 : vector<16x128xf32>
    %c0_5 = arith.constant 0 : index
    %c0_6 = arith.constant 0 : index
    %6 = vector.load %arg4[%c0_5, %c0_6] : memref<16x128xf32, #tpu.memory_space<vmem>>, vector<16x128xf32>
    tpu.vector_store %arg4[%c0_5, %c0_6], %5 {strides = array<i32>} : memref<16x128xf32, #tpu.memory_space<vmem>>, vector<16x128xf32>,
    return
  }
  func.func @transform_0(%arg0: i32) -> (i32, i32) {
    %c0_i32 = arith.constant 0 : i32
    %c0_i32_0 = arith.constant 0 : i32
    return %arg0, %c0_i32 : i32, i32
  }
  func.func @transform_1(%arg0: i32) -> (i32, i32) {
    %c0_i32 = arith.constant 0 : i32
    %c0_i32_0 = arith.constant 0 : i32
    %c0_i32_1 = arith.constant 0 : i32
    return %c0_i32, %c0_i32_0 : i32, i32
  }
  func.func @transform_2(%arg0: i32) -> (i32, i32) {
    %c0_i32 = arith.constant 0 : i32
    %c0_i32_0 = arith.constant 0 : i32
    %c0_i32_1 = arith.constant 0 : i32
    return %c0_i32, %c0_i32_0 : i32, i32
  }
  func.func @transform_3(%arg0: i32) -> (i32, i32) {
    %c0_i32 = arith.constant 0 : i32
    %c0_i32_0 = arith.constant 0 : i32
    return %arg0, %c0_i32 : i32, i32
  }
}

</mosaic_0001>

<bundles_post_ra>
// kernel: fast_rcnn_predictor_fused.1
= control target key start
LH: loop header
LB: loop body
LE: loop exit
PB: predicated region body
PF: predicated region fallthrough
CT: control target
= control target key end

     0   :  { %8 = vsyncpa [#allocation3], 0  ;;  %s113_s15 = smov [#allocation2]   ;;  %s114_s17 = smov 128   ;;  %s154_s0 = inlined_call_operand.vmem [shape: f32[16,32], index: 0, kind: input, shape index: {}]   ;;  %s155_s1 = inlined_call_operand.hbm [shape: f32[32,128], index: 1, kind: input, shape index: {}]   ;;  %s156_s2 = inlined_call_operand.vmem [shape: f32[1,128], index: 2, kind: input, shape index: {}]   ;;  %s157_s3 = inlined_call_operand.vmem [shape: f32[16,128], index: 3, kind: output, shape index: {}]  }
   0x1   :  { %s15_s14 = sshll.u32 %s155_s1, 4  ;;  %s17_s16 = sshll.u32 %s113_s15, 4  ;;  %s16_s14 = int_to_ptr.hbm [resolvable:$true] %s15_s14  ;;  %s18_s16 = int_to_ptr.vmem [resolvable:$true] %s17_s16 }
   0x2   :  { %s115_s18 = smov 8  }
   0x3   :  { %23 = dma.hbm_to_vmem [thread:$0]  %s16_s14, 512, %s18_s16, [#allocation3], %s114_s17, %s114_s17, %s115_s18  }
   0x4   :  { %111 = dma.done.wait [#allocation3], 512  }
   0x5   :  { %112 = vsyncadd [#allocation3], 4294966784  ;;  %v35_v0 = vld [vmem:[#allocation2 + $0x18] sm:$0xff]  ;;  %v34_v1 = vld [vmem:[#allocation2 + $0x10] sm:$0xff]  ;;  %vm40_vm0 = vcmask 261120  }
   0x6   :  { %59 = vmatpush.msra.mxu0 %v35_v0  ;;  %79 = vmatpush.msra.mxu1 %v35_v0  ;;  %v33_v2 = vld [vmem:[#allocation2 + $0x8] sm:$0xff]  ;;  %v32_v3 = vld [vmem:[#allocation2] sm:$0xff] }
   0x7   :  { %v30_v4 = vld [vmem:[%s154_s0] sm:$0xff]  ;;  %v31_v5 = vld [vmem:[%s154_s0 + $0x8] sm:$0xff] }
   0x8   :  { %60 = vmatpush.msra.mxu0 %v34_v1  ;;  %80 = vmatpush.msra.mxu1 %v34_v1  ;;  %v86_v6 = vld [vmem:[%s156_s2] ss:$0 sm:$0xff] }
   0xa   :  { %61 = vmatpush.msra.mxu0 %v33_v2  ;;  %81 = vmatpush.msra.mxu1 %v33_v2 }
   0xc   :  { %62 = vmatpush.msra.mxu0 %v32_v3  ;;  %82 = vmatpush.msra.mxu1 %v32_v3 }
   0xd   :  { %77 = vmatmul.msk.f32.vlgmr.msra.gmra.mxu0 %vm40_vm0, %v30_v4  ;;  %78 = vmatmul.msk.f32.vlgmr.msra.gmra.mxu1 %vm40_vm0, %v31_v5 }
  0x8a   :  { %v64_v7 = vpop.f32.mrf.mxu0  ;;  %v67_v8 = vpop.f32.mrf.mxu1 }
  0x8b   :  { %v65_v9 = vadd.f32 %v86_v6, %v64_v7  ;;  %v68_v10 = vadd.f32 %v86_v6, %v67_v8 }
  0x8d   :  { %70 = vst [vmem:[%s157_s3] sm:$0xff] %v65_v9 }
  0x8e   :  { %71 = vst [vmem:[%s157_s3 + $0x8] sm:$0xff] %v68_v10 }
  0x8f   :  { %76 = vsyncpa [#allocation3], 1 }

</bundles_post_ra>
